<compile_context>
chip_gen: v7x
topology: tpu7x:2x2x1
jax: 0.10.0
libtpu: 0.0.40
codegen_flags: <defaults>
</compile_context>

<pallas_src>
import functools

import jax
import jax.numpy as jnp
from jax.experimental import pallas as pl
from jax.experimental.pallas import tpu as pltpu


def _round_up(x, m):
    return (x + m - 1) // m * m


def _ce_mask_kernel(n_rows, logits_ref, side_ref, out_ref):
    """One row-tile of masked cross entropy.

    logits_ref: (TM, C)  source dtype (f32 or bf16)
    side_ref:   (TM, 2)  f32, packed [label, folded_mask_weight]
    out_ref:    (8, 128) f32 per-tile partial sum (scalar broadcast)
    """
    tm = logits_ref.shape[0]
    logits = logits_ref[...]                       # (TM, C) source dtype
    side = side_ref[...]                           # (TM, 2) f32
    labels = side[:, 0:1].astype(jnp.int32)        # (TM, 1)
    w = side[:, 1:2]                               # (TM, 1) folded weight

    # Pass 1 (source dtype): row max + one-hot target gather from RAW logits.
    # (single selected element per row -> exact in bf16 as well)
    row_max = jnp.max(logits, axis=-1, keepdims=True)             # (TM, 1)
    col = jax.lax.broadcasted_iota(jnp.int32, logits.shape, 1)
    tgt = jnp.sum(jnp.where(col == labels, logits, jnp.zeros_like(logits)),
                  axis=-1, keepdims=True)                          # (TM, 1)

    # Pass 2 (f32): numerically stable log-sum-exp.
    row_max_f = row_max.astype(jnp.float32)
    shifted = logits.astype(jnp.float32) - row_max_f               # (TM, C)
    sum_exp = jnp.sum(jnp.exp(shifted), axis=-1, keepdims=True)    # (TM, 1)
    loss = row_max_f + jnp.log(sum_exp) - tgt.astype(jnp.float32)  # (TM, 1)

    # Ragged-tail guard: rows >= n_rows in the last tile hold garbage logits
    # (possibly inf/NaN after exp/log).  SELECT, not multiply, so NaN * 0
    # cannot poison the partial sum.
    rid = jax.lax.broadcasted_iota(jnp.int32, (tm, 1), 0)
    valid = (pl.program_id(0) * tm + rid) < n_rows
    contrib = jnp.where(valid, loss * w, 0.0)                      # (TM, 1)

    s = jnp.sum(contrib, axis=0, keepdims=True)                    # (1, 1)
    out_ref[...] = jnp.zeros(out_ref.shape, jnp.float32) + s       # broadcast


_MAX_ROW_TILE = 8192


def _vmem_capacity_bytes():
    try:
        return int(pltpu.get_tpu_info().vmem_capacity_bytes)
    except Exception:  # interpret mode / older runtime: assume smallest (v7x)
        return 64 * 1024 * 1024


def _pick_tile_and_limit(N, C, itemsize):
    vmem_cap = _vmem_capacity_bytes()
    if vmem_cap >= 100 * (1 << 20):        # v5e / v6e: 128 MiB physical VMEM
        target_block = 7 * (1 << 20)       # ~7 MiB logits block
        vmem_limit = 96 * (1 << 20)
    else:                                  # v7x: 64 MiB physical per TC
        target_block = 7 * (1 << 19)       # ~3.5 MiB logits block
        vmem_limit = 48 * (1 << 20)

    align = max(8, 32 // max(1, itemsize))  # sublane packing (16 for bf16)

    # Per-row VMEM cost: double-buffered source block + ~2 (TM, C) f32 temps
    # (cast + shifted/exp) + the lane-padded (TM, 2)->(TM, 128) side buffers.
    per_row = 2 * C * itemsize + 2 * C * 4 + 2 * 128 * 4
    budget = vmem_limit - 6 * (1 << 20)     # headroom (out block, misc)

    tm = min(target_block // max(1, C * itemsize),
             budget // per_row,
             _MAX_ROW_TILE)
    tm = max(align, (tm // align) * align)
    # Guarantee >= 2 grid steps when N allows it so the "parallel" axis can
    # shard across both TensorCores on v7x (no effect on 1-TC chips).
    tm = min(tm, max(align, _round_up(pl.cdiv(N, 2), align)))
    tm = min(tm, _round_up(N, align))
    return int(tm), int(vmem_limit)


@functools.partial(jax.jit, static_argnames=("tm", "vmem_limit"))
def _ce_with_mask_impl(y_pred, y_true, pos_mask, label_mask, seq_mask, *,
                       tm, vmem_limit):
    N, C = y_pred.shape
    num_tiles = pl.cdiv(N, tm)
    itemsize = jnp.dtype(y_pred.dtype).itemsize

    pos = pos_mask.astype(jnp.float32)
    lab = label_mask.astype(jnp.float32)
    seq = seq_mask.astype(jnp.float32)
    pos_den = jnp.sum(pos)
    lab_den = jnp.sum(lab)
    seq_den = jnp.sum(seq)
    # Fold the three masked means into one per-row weight (identical math):
    #   sum(loss * w) == pos_loss + label_loss/2 + seq_loss/3
    w = pos / pos_den + lab / (2.0 * lab_den) + seq / (3.0 * seq_den)

    # Packed side stream [label, weight]; labels as f32 are exact for C < 2^24
    side = jnp.stack([y_true.astype(jnp.float32), w], axis=-1)      # (N, 2)

    cost = pl.CostEstimate(
        flops=6 * N * C,
        transcendentals=N * C,
        bytes_accessed=N * C * itemsize + N * 2 * 4 + num_tiles * 8 * 128 * 4)

    # TODO(synk): for vocab-scale C where a (tm, C) block cannot fit in VMEM
    # (v7x: 64 MiB), add a class-chunked streaming-LSE grid axis.
    partials = pl.pallas_call(
        functools.partial(_ce_mask_kernel, N),
        out_shape=jax.ShapeDtypeStruct((num_tiles * 8, 128), jnp.float32),
        grid=(num_tiles,),
        in_specs=[
            pl.BlockSpec((tm, C), lambda i: (i, 0)),   # logits, source dtype
            pl.BlockSpec((tm, 2), lambda i: (i, 0)),   # packed [label, w]
        ],
        out_specs=pl.BlockSpec((8, 128), lambda i: (i, 0)),
        compiler_params=pltpu.CompilerParams(
            dimension_semantics=("parallel",),
            vmem_limit_bytes=vmem_limit),
        cost_estimate=cost,
    )(y_pred, side)

    partials = partials.reshape(num_tiles, 8, 128)
    return jnp.sum(partials[:, 0, 0])


def cross_entropy_loss_with_mask(y_pred, y_true, pos_mask, label_mask,
                                 seq_mask, *, tm=None):
    assert y_pred.ndim == 2, "y_pred must be (N, num_classes)"
    N, C = y_pred.shape
    assert C < 2 ** 24, "labels ride in f32; exact only for C < 2^24"
    itemsize = jnp.dtype(y_pred.dtype).itemsize
    auto_tm, vmem_limit = _pick_tile_and_limit(N, C, itemsize)
    if tm is None:
        tm = auto_tm
    else:
        align = max(8, 32 // max(1, itemsize))
        tm = max(align, _round_up(int(tm), align))
        tm = min(tm, _round_up(N, align))
    return _ce_with_mask_impl(y_pred, y_true, pos_mask, label_mask, seq_mask,
                              tm=int(tm), vmem_limit=int(vmem_limit))


def _reference(y_pred, y_true, pos_mask, label_mask, seq_mask):
    logits = y_pred.astype(jnp.float32)
    lse = jax.scipy.special.logsumexp(logits, axis=-1)
    tgt = jnp.take_along_axis(
        logits, y_true.astype(jnp.int32)[:, None], axis=-1)[:, 0]
    loss = lse - tgt
    pos_loss = jnp.sum(loss * pos_mask) / jnp.sum(pos_mask)
    label_loss = jnp.sum(loss * label_mask) / jnp.sum(label_mask)
    seq_loss = jnp.sum(loss * seq_mask) / jnp.sum(seq_mask)
    return pos_loss + label_loss / 2.0 + seq_loss / 3.0


if __name__ == "__main__":
    key = jax.random.PRNGKey(0)

    # case 1: module-sized example (batch=2, seq=8 -> N=16 rows, 32 classes)
    k1, k2, k3, k4, k5, key = jax.random.split(key, 6)
    batch, seq_len, n_classes = 2, 8, 32
    N = batch * seq_len
    y_pred = jax.random.normal(k1, (N, n_classes), dtype=jnp.float32)
    y_true = jax.random.randint(k2, (N,), 0, n_classes, dtype=jnp.int32)
    pos_mask = (jax.random.uniform(k3, (N,)) < 0.4).astype(jnp.float32)
    label_mask = (jax.random.uniform(k4, (N,)) < 0.3).astype(jnp.float32)
    seq_mask = (jax.random.uniform(k5, (N,)) < 0.7).astype(jnp.float32)
    # guard against all-zero masks (would be NaN in torch too)
    pos_mask = pos_mask.at[0].set(1.0)
    label_mask = label_mask.at[1].set(1.0)
    seq_mask = seq_mask.at[2].set(1.0)

    out = cross_entropy_loss_with_mask(y_pred, y_true, pos_mask, label_mask,
                                       seq_mask)
    out = jax.block_until_ready(out)
    ref = _reference(y_pred, y_true, pos_mask, label_mask, seq_mask)
    assert jnp.allclose(out, ref, rtol=1e-5, atol=1e-5), (out, ref)

    # case 2: ragged N (multiple tiles + in-kernel tail guard), small tile
    k1, k2, k3, k4, k5, key = jax.random.split(key, 6)
    N2, C2 = 200, 128
    y_pred2 = jax.random.normal(k1, (N2, C2), dtype=jnp.float32)
    y_true2 = jax.random.randint(k2, (N2,), 0, C2, dtype=jnp.int32)
    pos2 = (jax.random.uniform(k3, (N2,)) < 0.4).astype(jnp.float32)
    lab2 = (jax.random.uniform(k4, (N2,)) < 0.3).astype(jnp.float32)
    seq2 = (jax.random.uniform(k5, (N2,)) < 0.7).astype(jnp.float32)
    pos2 = pos2.at[0].set(1.0)
    lab2 = lab2.at[1].set(1.0)
    seq2 = seq2.at[2].set(1.0)

    out2 = cross_entropy_loss_with_mask(y_pred2, y_true2, pos2, lab2, seq2,
                                        tm=64)
    out2 = jax.block_until_ready(out2)
    ref2 = _reference(y_pred2, y_true2, pos2, lab2, seq2)
    assert jnp.allclose(out2, ref2, rtol=1e-5, atol=1e-4), (out2, ref2)

    # case 3: bf16 logits (source-dtype first pass), auto tile
    k1, k2, k3, k4, k5, key = jax.random.split(key, 6)
    N3, C3 = 64, 256
    y_pred3 = jax.random.normal(k1, (N3, C3), dtype=jnp.float32).astype(
        jnp.bfloat16)
    y_true3 = jax.random.randint(k2, (N3,), 0, C3, dtype=jnp.int32)
    pos3 = (jax.random.uniform(k3, (N3,)) < 0.4).astype(jnp.float32)
    lab3 = (jax.random.uniform(k4, (N3,)) < 0.3).astype(jnp.float32)
    seq3 = (jax.random.uniform(k5, (N3,)) < 0.7).astype(jnp.float32)
    pos3 = pos3.at[0].set(1.0)
    lab3 = lab3.at[1].set(1.0)
    seq3 = seq3.at[2].set(1.0)

    out3 = cross_entropy_loss_with_mask(y_pred3, y_true3, pos3, lab3, seq3)
    out3 = jax.block_until_ready(out3)
    ref3 = _reference(y_pred3, y_true3, pos3, lab3, seq3)
    assert jnp.allclose(out3, ref3, rtol=1e-4, atol=1e-3), (out3, ref3)

    print("KERNEL_OK")
</pallas_src>

<mosaic_0001>
module attributes {stable_mosaic.version = 11 : i64} {
  func.func @_ce_mask_kernel(%arg0: i32, %arg1: memref<8x32xf32, #tpu.memory_space<vmem>>, %arg2: memref<8x2xf32, #tpu.memory_space<vmem>>, %arg3: memref<8x128xf32, #tpu.memory_space<vmem>>) attributes {dimension_semantics = [#tpu.dimension_semantics<parallel>], iteration_bounds = array<i64: 2>, scalar_prefetch = 0 : i64, scratch_operands = 0 : i64, tpu.core_type = #tpu.core_type<tc>, window_params = [{transform_indices = @transform_0, window_bounds = array<i64: 8, 32>}, {transform_indices = @transform_1, window_bounds = array<i64: 8, 2>}, {transform_indices = @transform_2, window_bounds = array<i64: 8, 128>}]} {
    %c0 = arith.constant 0 : index
    %c0_0 = arith.constant 0 : index
    %0 = vector.load %arg1[%c0, %c0_0] : memref<8x32xf32, #tpu.memory_space<vmem>>, vector<8x32xf32>
    %c0_1 = arith.constant 0 : index
    %c0_2 = arith.constant 0 : index
    %1 = vector.load %arg2[%c0_1, %c0_2] : memref<8x2xf32, #tpu.memory_space<vmem>>, vector<8x2xf32>
    %2 = vector.extract_strided_slice %1 {offsets = [0, 0], sizes = [8, 1], strides = [1, 1]} : vector<8x2xf32> to vector<8x1xf32>
    %3 = arith.fptosi %2 : vector<8x1xf32> to vector<8x1xi32>
    %4 = vector.extract_strided_slice %1 {offsets = [0, 1], sizes = [8, 1], strides = [1, 1]} : vector<8x2xf32> to vector<8x1xf32>
    %cst = arith.constant dense<0xFF800000> : vector<8xf32>
    %5 = vector.multi_reduction <maximumf>, %0, %cst [1] : vector<8x32xf32> to vector<8xf32>
    %6 = vector.shape_cast %5 : vector<8xf32> to vector<8x1xf32>
    %7 = tpu.iota {dimensions = array<i32: 1>} : vector<8x32xi32>
    %8 = vector.broadcast %3 : vector<8x1xi32> to vector<8x32xi32>
    %9 = arith.cmpi eq, %7, %8 : vector<8x32xi32>
    %cst_3 = arith.constant 0.000000e+00 : f32
    %10 = vector.broadcast %cst_3 : f32 to vector<8x32xf32>
    %11 = arith.select %9, %0, %10 : vector<8x32xi1>, vector<8x32xf32>
    %cst_4 = arith.constant dense<0.000000e+00> : vector<8xf32>
    %12 = vector.multi_reduction <add>, %11, %cst_4 [1] : vector<8x32xf32> to vector<8xf32>
    %13 = vector.shape_cast %12 : vector<8xf32> to vector<8x1xf32>
    %14 = vector.broadcast %6 : vector<8x1xf32> to vector<8x32xf32>
    %15 = arith.subf %0, %14 : vector<8x32xf32>
    %16 = math.exp %15 : vector<8x32xf32>
    %cst_5 = arith.constant dense<0.000000e+00> : vector<8xf32>
    %17 = vector.multi_reduction <add>, %16, %cst_5 [1] : vector<8x32xf32> to vector<8xf32>
    %18 = vector.shape_cast %17 : vector<8xf32> to vector<8x1xf32>
    %19 = math.log %18 : vector<8x1xf32>
    %20 = arith.addf %6, %19 : vector<8x1xf32>
    %21 = arith.subf %20, %13 : vector<8x1xf32>
    %22 = tpu.iota {dimensions = array<i32: 0>} : vector<8x1xi32>
    %c8_i32 = arith.constant 8 : i32
    %23 = arith.muli %arg0, %c8_i32 : i32
    %24 = vector.broadcast %23 : i32 to vector<8x1xi32>
    %25 = arith.addi %24, %22 : vector<8x1xi32>
    %c16_i32 = arith.constant 16 : i32
    %26 = vector.broadcast %c16_i32 : i32 to vector<8x1xi32>
    %27 = arith.cmpi slt, %25, %26 : vector<8x1xi32>
    %28 = arith.mulf %21, %4 : vector<8x1xf32>
    %cst_6 = arith.constant 0.000000e+00 : f32
    %29 = vector.broadcast %cst_6 : f32 to vector<8x1xf32>
    %30 = arith.select %27, %28, %29 : vector<8x1xi1>, vector<8x1xf32>
    %cst_7 = arith.constant dense<0.000000e+00> : vector<1xf32>
    %31 = vector.multi_reduction <add>, %30, %cst_7 [0] : vector<8x1xf32> to vector<1xf32>
    %32 = vector.shape_cast %31 : vector<1xf32> to vector<1x1xf32>
    %cst_8 = arith.constant 0.000000e+00 : f32
    %33 = vector.broadcast %cst_8 : f32 to vector<8x128xf32>
    %34 = vector.broadcast %32 : vector<1x1xf32> to vector<8x128xf32>
    %35 = arith.addf %33, %34 : vector<8x128xf32>
    %c0_9 = arith.constant 0 : index
    %c0_10 = arith.constant 0 : index
    %36 = vector.load %arg3[%c0_9, %c0_10] : memref<8x128xf32, #tpu.memory_space<vmem>>, vector<8x128xf32>
    tpu.vector_store %arg3[%c0_9, %c0_10], %35 {strides = array<i32>} : memref<8x128xf32, #tpu.memory_space<vmem>>, vector<8x128xf32>,
    return
  }
  func.func @transform_0(%arg0: i32) -> (i32, i32) {
    %c0_i32 = arith.constant 0 : i32
    %c0_i32_0 = arith.constant 0 : i32
    return %arg0, %c0_i32 : i32, i32
  }
  func.func @transform_1(%arg0: i32) -> (i32, i32) {
    %c0_i32 = arith.constant 0 : i32
    %c0_i32_0 = arith.constant 0 : i32
    return %arg0, %c0_i32 : i32, i32
  }
  func.func @transform_2(%arg0: i32) -> (i32, i32) {
    %c0_i32 = arith.constant 0 : i32
    %c0_i32_0 = arith.constant 0 : i32
    return %arg0, %c0_i32 : i32, i32
  }
}

</mosaic_0001>

<bundles_post_ra>
// kernel: _ce_with_mask_impl.1
= control target key start
LH: loop header
LB: loop body
LE: loop exit
PB: predicated region body
PF: predicated region fallthrough
CT: control target
= control target key end

     0   :  { %s326_s9 = smov 0   ;;  %s359_s0 = inlined_call_operand.vmem [shape: f32[16,32], index: 0, kind: input, shape index: {}]   ;;  %s360_s1 = inlined_call_operand.vmem [shape: f32[16,2], index: 1, kind: input, shape index: {}]   ;;  %s361_s2 = inlined_call_operand.vmem [shape: f32[16,128], index: 2, kind: output, shape index: {}]  }
   0x1 LB: > { %s332_s10 = sadd.s32 4294967295, %s307_s9   ;;  %p275_p0 = scmp.ge.s32.totalorder %s307_s9, 1  ;;  %s307_s9 = sphi %s326_s9, %s12_s9  }
   0x2   : > { %p120_p1 = scmp.lt.s32.totalorder %s307_s9, 3 }
   0x4   : > { %p121_p2 = pnand %p275_p0, %p120_p1 }
   0x5   : > { %p144_p3 = scmp.lt.s32.totalorder (!%p121_p2), %s332_s10, 1  ;;  %v309_v0 = vmov (!%p121_p2), 0   ;;  %vm159_vm0 = vcmask (!%p121_p2), 261120   ;;  %v163_v9 = vlaneseq (!%p121_p2)  ;;  %v310_v16 = vmov (!%p121_p2), 1   ;;  %s279_s19 = sshll.u32 (!%p121_p2), %s332_s10, 3 }
   0x6   : > { %124 = sbr.rel (%p121_p2) target bundleno = 481 (0x1e1), region = 28  ;;  %294 = vset.pattern.permute.xlu0 (!%p121_p2), %v309_v0  ;;  %295 = vset.pattern.permute.xlu1 (!%p121_p2), %v310_v16  ;;  %v186_v19 = vstv (!%p121_p2), %s279_s19  ;;  %vm191_vm3 = vcmask (!%p121_p2), 15368  }
   0x7   : > { %v164_v10 = vand.u32 (!%p121_p2), 127, %v163_v9  ;;  %v184_v18 = vshrl.u32 (!%p121_p2), %v163_v9, 7 }
   0x9   : > { %v187_v22 = vadd.s32 (!%p121_p2), %v186_v19, %v184_v18 }
   0xb   : > { %vm188_vm2 = vcmp.lt.s32.totalorder (!%p121_p2), %v187_v22, 16 }
   0xd   : > { %s145_s11 = scalar_select %p144_p3, %s332_s10, 1 }
   0xf   : > { %s338_s12 = sshll.u32 %s145_s11, 3 }
  0x10   : > { %s147_s15 = scalar_lea.vmem %s359_s0, %s338_s12  ;;  %s151_s18 = scalar_lea.vmem %s360_s1, %s338_s12 }
  0x11   : > { %v156_v1 = vld [vmem:[%s147_s15] sm:$0xff]  ;;  %s155_s22 = scalar_lea.vmem %s361_s2, %s338_s12 }
  0x12   : > { %v160_v2 = vsel %vm159_vm0, %v156_v1, -inf  ;;  %v157_v3 = vld [vmem:[%s151_s18] sm:$0xff] }
  0x13   : > { %161 = vmax.xlane.f32.xlu0 %v160_v2  ;;  %v282_v4 = vtrunc.f32 %v157_v3 }
  0x15   : > { %v283_v5 = vcvt.f32.s32 %v282_v4 }
  0x29   : > { %166 = vperm.xlu0 %294, %v283_v5  }
  0x2d   : > { %296 = vset.pattern.permute.xlu0 %v310_v16 }
  0xa0   : > { %v162_v6 = vpop.xlane.xlu0 %161 }
  0xa1   : > { %v173_v7 = vsub.f32 %v156_v1, %v162_v6 }
  0xa3   : > { %v174_v8 = vmul.f32 1.442695, %v173_v7 }
  0xa5   : > { %297 = vpow2.f32 %v174_v8 }
  0xa8   : > { %v167_v11 = vpop.permute.xlu0 %166 }
  0xa9   : > { %vm168_vm1 = vcmp.eq.s32.totalorder %v164_v10, %v167_v11 }
  0xaa   : > { %v169_v13 = vsel %vm168_vm1, %v156_v1, 0.0 }
  0xab   : > { %v170_v15 = vsel %vm159_vm0, %v169_v13, 0.0 }
  0xaf   : > { %v298_v12 = vpop.eup %297 }
  0xb0   : > { %v176_v14 = vsel %vm159_vm0, %v298_v12, 0.0 }
  0xb1   : > { %177 = vadd.xlane.f32.xlu1 %v176_v14 }
  0xb5   : > { %171 = vadd.xlane.f32.xlu1 %v170_v15 }
 0x13e   : > { %v178_v17 = vpop.xlane.xlu1 %177 }
 0x13f   : > { %299 = vlog2.f32 %v178_v17 }
 0x142   : > { %v172_v23 = vpop.xlane.xlu1 %171 }
 0x149   : > { %v300_v20 = vpop.eup %299 }
 0x14a   : > { %v180_v21 = vmul.f32 0.6931472, %v300_v20 }
 0x14c   : > { %v181_v24 = vadd.f32 %v180_v21, %v162_v6 }
 0x14e   : > { %v182_v25 = vsub.f32 %v181_v24, %v172_v23 }
 0x150   : > { %v189_v26 = vmul.f32 %v182_v25, %v157_v3 }
 0x152   : > { %v190_v27 = vsel %vm188_vm2, %v189_v26, 0.0 }
 0x153   : > { %v192_v28 = vsel %vm191_vm3, %v190_v27, 0.0 }
 0x154   : > { %v193_v29 = vrot.slane %v192_v28, 4 }
 0x156   : > { %v194_v30 = vadd.f32 %v193_v29, %v192_v28 }
 0x158   : > { %v195_v31 = vrot.slane %v194_v30, 2 }
 0x15a   : > { %v196_v32 = vadd.f32 %v195_v31, %v194_v30 }
 0x15c   : > { %v197_v33 = vrot.slane %v196_v32, 1 }
 0x15e   : > { %v198_v34 = vadd.f32 %v197_v33, %v196_v32 }
 0x160   : > { %201 = vperm.xlu1 %295, %v198_v34  }
 0x1df   : > { %v202_v35 = vpop.permute.xlu1 %201 }
 0x1e0   : > { %205 = vst [vmem:[%s155_s22] sm:$0xff] %v202_v35 }
 0x1e1 PF: > { %s12_s9 = sadd.s32 1, %s307_s9  }
 0x1e2   : > { %p9_p4 = scmp.ge.s32.totalorder %s12_s9, 4  }
 0x1e4   :  { %11 = sbr.rel (!%p9_p4) target bundleno = 1 (0x1), region = 61 }

</bundles_post_ra>
